<compile_context>
chip_gen: v7x
topology: tpu7x:2x2x1
jax: 0.10.0
libtpu: 0.0.40
codegen_flags: <defaults>
</compile_context>

<pallas_src>
import functools

import numpy as np
import jax
import jax.numpy as jnp
from jax.experimental import pallas as pl
from jax.experimental.pallas import tpu as pltpu


# ----------------------------------------------------------------------------
# Host-side constant builders
# ----------------------------------------------------------------------------

def _flip_freq(n):
    # matches even_flip / odd_flip from the PyTorch reference
    m = n // 2
    if n % 2 == 1:
        col = np.arange(0, m + 1)
        flipcol = col[m - 1::-1]
    else:
        col = np.arange(0, m)
        flipcol = col[m::-1]
    return np.concatenate((col, flipcol), 0)


def _dist_map(H, W):
    # matches dist(target) from the PyTorch reference (unnormalized)
    fh = _flip_freq(H)[:, None].astype(np.float64)
    fw = _flip_freq(W)[None, :].astype(np.float64)
    return np.sqrt(fh * fh + fw * fw)


def _dft_cos_sin(n):
    # ortho DFT: F[k, m] = exp(-2*pi*i*k*m/n)/sqrt(n) = C - i*S
    k = np.arange(n)[:, None].astype(np.float64)
    m = np.arange(n)[None, :].astype(np.float64)
    ang = 2.0 * np.pi * k * m / n
    return np.cos(ang) / np.sqrt(n), np.sin(ang) / np.sqrt(n)


def packed_w_matrix(W):
    # [C_W | S_W] of shape (W, 2W), bf16 (single stage-1 MXU operand)
    c, s = _dft_cos_sin(W)
    m = np.concatenate([c, s], axis=1).astype(np.float32)
    return jnp.asarray(m).astype(jnp.bfloat16)


def packed_h_matrix(H):
    # [[C_H, -S_H], [S_H, C_H]] of shape (2H, 2H), bf16 (fused stage-2 operand)
    c, s = _dft_cos_sin(H)
    m = np.block([[c, -s], [s, c]]).astype(np.float32)
    return jnp.asarray(m).astype(jnp.bfloat16)


def packed_weight(H, W, denom):
    # [[dist],[dist]] / denom of shape (2H, W), f32 -- weights [[X_r],[-X_i]]
    d = _dist_map(H, W) / denom
    return jnp.asarray(np.concatenate([d, d], axis=0).astype(np.float32))


# ----------------------------------------------------------------------------
# Kernel
# ----------------------------------------------------------------------------

def energy_kernel(feat_ref, lab_ref, wpack_ref, hpack_ref, wdup_ref, out_ref,
                  *, alpha, sigma, bt, h, w, bf16_mm_out):
    # --- prologue: I1 = label + alpha * hardtanh(feat / sigma, 0, 1) ---------
    # f32 prologue (portable to v5e which has no bf16 VALU); single bf16 cast.
    feat = feat_ref[...].astype(jnp.float32)                     # (bt*h, w)
    tgt = lab_ref[...].astype(jnp.float32)                       # (bt*h, w)
    i1 = (tgt + alpha * jnp.clip(feat * (1.0 / sigma), 0.0, 1.0)
          ).astype(jnp.bfloat16)

    # --- stage 1: all bt planes at once, packed constant ---------------------
    #   AR = I1 @ [C_W | S_W]  ->  [a | q]  with a = I1@C_W, q = I1@S_W = -imag
    if bf16_mm_out:
        ar = jnp.dot(i1, wpack_ref[...],
                     preferred_element_type=jnp.bfloat16)        # (bt*h, 2w)
    else:
        ar = jnp.dot(i1, wpack_ref[...],
                     preferred_element_type=jnp.float32).astype(jnp.bfloat16)

    # Split the packed halves once per grid step (free when W % 128 == 0;
    # otherwise a small lane relayout -- unavoidable because stage 2 needs
    # real/imag stacked along sublanes, and it overlaps with MXU work).
    a_part = ar[:, :w]                                           # (bt*h, w)
    q_part = ar[:, w:]                                           # (bt*h, w)

    hm = hpack_ref[...]        # [[C_H,-S_H],[S_H,C_H]]  (2h, 2h) bf16
    wdup = wdup_ref[...]       # [[dist],[dist]]/(B*H*W) (2h, w)  f32

    # --- stage 2: one fused matmul per plane, weighted reduce folded in ------
    wacc = jnp.zeros((1, w), jnp.float32)
    for b in range(bt):
        p = jnp.concatenate([a_part[b * h:(b + 1) * h, :],
                             q_part[b * h:(b + 1) * h, :]], axis=0)  # (2h, w)
        # [[X_r],[-X_i]] = [[C_H,-S_H],[S_H,C_H]] @ [[a],[q]]
        px = jnp.dot(hm, p, preferred_element_type=jnp.float32)      # (2h, w)
        wacc = wacc + jnp.sum(wdup * (px * px), axis=0, keepdims=True)

    # per-grid-step partial-sum row; final reduction happens outside the kernel
    out_ref[0] = wacc


# ----------------------------------------------------------------------------
# Block sizing / VMEM budgeting
# ----------------------------------------------------------------------------

def _estimate_vmem_bytes(bt, H, W, feat_bytes, lab_bytes):
    """Conservative per-step VMEM estimate: double-buffered streamed inputs,
    worst-case double-buffered constants, and in-kernel temporaries."""
    blk = bt * H * W
    stream = 2 * blk * (feat_bytes + lab_bytes)
    consts = 2 * (W * (2 * W) * 2            # [C_W | S_W]            bf16
                  + (2 * H) * (2 * H) * 2    # [[C_H,-S_H],[S_H,C_H]] bf16
                  + (2 * H) * W * 4)         # duplicated weight map  f32
    temps = blk * (4 + 4 + 2 + 8 + 2 + 2) + H * W * (4 + 8 + 8 + 8)
    return stream + consts + temps + (1 << 20)


def _pick_block_planes(B, H, W, feat_bytes, lab_bytes, budget):
    divisors = [d for d in range(1, B + 1) if B % d == 0]
    # (8,128) rule: the (bt*H, W) block's sublane dim must be a multiple of 8
    # unless it spans the whole array.
    aligned = [d for d in divisors if (d * H) % 8 == 0 or d == B]
    fits = [d for d in aligned
            if _estimate_vmem_bytes(d, H, W, feat_bytes, lab_bytes) <= budget]
    if not fits:
        raise ValueError(
            "EnergyLoss Pallas kernel: no batch block of shape (bt*%d, %d) "
            "satisfies the sublane-alignment rule and the VMEM budget "
            "(%d bytes). Sizes this large need the K-tiled variant "
            "(see TODO at top of file)." % (H, W, budget))
    # Prefer g = B // bt >= 2 so a megacore chip (v7x) can split the batch
    # axis across both TensorCores and the input DMAs pipeline across steps.
    multi_step = [d for d in fits if B // d >= 2]
    pool = multi_step if multi_step else fits
    # Within the pool, bigger blocks amortize the ~0.35us per-step overhead
    # and fill the MXU M dimension better.
    return max(pool)


# ----------------------------------------------------------------------------
# Wrapper
# ----------------------------------------------------------------------------

def energy_loss(feat, label, alpha=0.35, sigma=0.25):
    """Pallas equivalent of EnergyLoss_new(cuda, alpha, sigma)(feat, label)."""
    B, H, W = feat.shape
    # free layout plumbing only -- no dtype casts in the wrapper
    feat2d = feat.reshape(B * H, W)
    lab2d = label.reshape(B * H, W)     # accepts (B,1,H,W) or (B,H,W)

    # generation-aware VMEM budget (v7x: 64 MiB/core -> ~48 MiB usable;
    # v5e/v6e: 128 MiB -> ~96 MiB); default to the most constrained chip.
    try:
        cap = int(pltpu.get_tpu_info().vmem_capacity_bytes)
    except Exception:
        cap = 64 << 20
    budget = (cap * 3) // 4

    fbytes = feat.dtype.itemsize
    lbytes = label.dtype.itemsize
    bt = _pick_block_planes(B, H, W, fbytes, lbytes, budget)
    g = B // bt

    wpack = packed_w_matrix(W)                         # (W, 2W)  bf16
    hpack = packed_h_matrix(H)                         # (2H, 2H) bf16
    wdup = packed_weight(H, W, float(B * H * W))       # (2H, W)  f32

    est = _estimate_vmem_bytes(bt, H, W, fbytes, lbytes)
    vmem_limit = int(min(budget, max(2 * est, 8 << 20)))

    flops = (4 * B * H * W * W        # stage 1: (B*H, W) x (W, 2W)
             + 8 * B * H * H * W      # stage 2: B x (2H, 2H) x (2H, W)
             + 8 * B * H * W)         # prologue / |X|^2 / weighting
    bytes_accessed = (B * H * W * (fbytes + lbytes)
                      + int(wpack.size) * 2 + int(hpack.size) * 2
                      + int(wdup.size) * 4 + g * W * 4)
    cost = pl.CostEstimate(flops=int(flops), transcendentals=0,
                           bytes_accessed=int(bytes_accessed))

    def build(single_buffer_consts, bf16_mm_out):
        def const_spec(shape):
            idx = lambda b: (0,) * len(shape)
            if single_buffer_consts:
                # grid-invariant operands: double buffering buys nothing
                return pl.BlockSpec(shape, idx, pipeline_mode=pl.Buffered(1))
            return pl.BlockSpec(shape, idx)

        kernel = functools.partial(
            energy_kernel, alpha=float(alpha), sigma=float(sigma),
            bt=bt, h=H, w=W, bf16_mm_out=bf16_mm_out)

        return pl.pallas_call(
            kernel,
            out_shape=jax.ShapeDtypeStruct((g, 1, W), jnp.float32),
            grid_spec=pltpu.PrefetchScalarGridSpec(
                num_scalar_prefetch=0,
                grid=(g,),
                in_specs=[
                    pl.BlockSpec((bt * H, W), lambda b: (b, 0)),   # feat planes
                    pl.BlockSpec((bt * H, W), lambda b: (b, 0)),   # label planes
                    const_spec((W, 2 * W)),                        # [C_W | S_W]
                    const_spec((2 * H, 2 * H)),                    # H block matrix
                    const_spec((2 * H, W)),                        # dup. weights
                ],
                out_specs=pl.BlockSpec((1, 1, W), lambda b: (b, 0, 0)),
            ),
            compiler_params=pltpu.CompilerParams(
                dimension_semantics=("parallel",),
                vmem_limit_bytes=vmem_limit),
            cost_estimate=cost,
        )

    try:
        # preferred configuration: single-buffered constants + bf16 stage-1 out
        out = build(True, True)(feat2d, lab2d, wpack, hpack, wdup)
    except Exception:
        # conservative fallback known to compile everywhere:
        # double-buffered constants, f32 matmul results + explicit bf16 cast.
        out = build(False, False)(feat2d, lab2d, wpack, hpack, wdup)

    # final scalar reduction over per-step partial-sum rows runs in XLA
    return jnp.sum(out)


# ----------------------------------------------------------------------------
# Pure-JAX reference (mirrors the PyTorch forward, fft2-based)
# ----------------------------------------------------------------------------

def energy_loss_ref(feat, label, alpha=0.35, sigma=0.25):
    B, H, W = feat.shape
    tgt = label.reshape(B, H, W).astype(jnp.float32)
    idx = jnp.asarray(_dist_map(H, W).astype(np.float32))
    i1 = tgt + alpha * jnp.clip(feat.astype(jnp.float32) / sigma, 0.0, 1.0)
    dmn = jnp.fft.fft2(i1, norm="ortho")
    dmn2 = jnp.real(dmn) ** 2 + jnp.imag(dmn) ** 2
    return jnp.sum(idx[None] * dmn2) / (B * H * W)


if __name__ == "__main__":
    key = jax.random.PRNGKey(0)
    k1, k2 = jax.random.split(key)

    B, H, W = 2, 16, 16
    alpha, sigma = 0.35, 0.25

    # feat = Z - 0.5, Z in [0, 1]
    feat = jax.random.uniform(k1, (B, H, W), jnp.float32) - 0.5
    # binary ground-truth label, NCHW with C=1
    label = (jax.random.uniform(k2, (B, 1, H, W)) > 0.5).astype(jnp.float32)

    out = energy_loss(feat, label, alpha=alpha, sigma=sigma)
    out = jax.block_until_ready(out)

    ref = energy_loss_ref(feat, label, alpha=alpha, sigma=sigma)
    assert jnp.allclose(out, ref, rtol=2e-2, atol=1e-3), (float(out), float(ref))

    print("KERNEL_OK")
</pallas_src>

<mosaic_0001>
module attributes {stable_mosaic.version = 11 : i64} {
  func.func @energy_kernel(%arg0: i32, %arg1: memref<16x16xf32, #tpu.memory_space<vmem>>, %arg2: memref<16x16xf32, #tpu.memory_space<vmem>>, %arg3: memref<16x32xbf16, #tpu.memory_space<vmem>>, %arg4: memref<32x32xbf16, #tpu.memory_space<vmem>>, %arg5: memref<32x16xf32, #tpu.memory_space<vmem>>, %arg6: memref<1x1x16xf32, #tpu.memory_space<vmem>>) attributes {dimension_semantics = [#tpu.dimension_semantics<parallel>], iteration_bounds = array<i64: 2>, scalar_prefetch = 0 : i64, scratch_operands = 0 : i64, tpu.core_type = #tpu.core_type<tc>, window_params = [{transform_indices = @transform_0, window_bounds = array<i64: 16, 16>}, {transform_indices = @transform_1, window_bounds = array<i64: 16, 16>}, {pipeline_mode = #tpu.pipeline_mode<synchronous>, transform_indices = @transform_2, window_bounds = array<i64: 16, 32>}, {pipeline_mode = #tpu.pipeline_mode<synchronous>, transform_indices = @transform_3, window_bounds = array<i64: 32, 32>}, {pipeline_mode = #tpu.pipeline_mode<synchronous>, transform_indices = @transform_4, window_bounds = array<i64: 32, 16>}, {transform_indices = @transform_5, window_bounds = array<i64: 1, 1, 16>}]} {
    %c0 = arith.constant 0 : index
    %c0_0 = arith.constant 0 : index
    %0 = vector.load %arg1[%c0, %c0_0] : memref<16x16xf32, #tpu.memory_space<vmem>>, vector<16x16xf32>
    %c0_1 = arith.constant 0 : index
    %c0_2 = arith.constant 0 : index
    %1 = vector.load %arg2[%c0_1, %c0_2] : memref<16x16xf32, #tpu.memory_space<vmem>>, vector<16x16xf32>
    %cst = arith.constant 4.000000e+00 : f32
    %2 = vector.broadcast %cst : f32 to vector<16x16xf32>
    %3 = arith.mulf %0, %2 : vector<16x16xf32>
    %cst_3 = arith.constant 0.000000e+00 : f32
    %cst_4 = arith.constant 1.000000e+00 : f32
    %4 = vector.broadcast %cst_3 : f32 to vector<16x16xf32>
    %5 = arith.maximumf %4, %3 : vector<16x16xf32>
    %6 = vector.broadcast %cst_4 : f32 to vector<16x16xf32>
    %7 = arith.minimumf %6, %5 : vector<16x16xf32>
    %cst_5 = arith.constant 3.500000e-01 : f32
    %8 = vector.broadcast %cst_5 : f32 to vector<16x16xf32>
    %9 = arith.mulf %8, %7 : vector<16x16xf32>
    %10 = arith.addf %1, %9 : vector<16x16xf32>
    %11 = arith.truncf %10 : vector<16x16xf32> to vector<16x16xbf16>
    %c0_6 = arith.constant 0 : index
    %c0_7 = arith.constant 0 : index
    %12 = vector.load %arg3[%c0_6, %c0_7] : memref<16x32xbf16, #tpu.memory_space<vmem>>, vector<16x32xbf16>
    %cst_8 = arith.constant dense<0.000000e+00> : vector<16x32xf32>
    %13 = tpu.matmul %11, %12, %cst_8 {dimension_numbers = #tpu.dot_dimension_numbers<[1], [0], [0], [1], [0, 0, 1, 1], [], []>} : vector<16x16xbf16>, vector<16x32xbf16>, vector<16x32xf32> -> vector<16x32xf32>
    %14 = arith.truncf %13 : vector<16x32xf32> to vector<16x32xbf16>
    %15 = vector.extract_strided_slice %14 {offsets = [0, 0], sizes = [16, 16], strides = [1, 1]} : vector<16x32xbf16> to vector<16x16xbf16>
    %16 = vector.extract_strided_slice %14 {offsets = [0, 16], sizes = [16, 16], strides = [1, 1]} : vector<16x32xbf16> to vector<16x16xbf16>
    %c0_9 = arith.constant 0 : index
    %c0_10 = arith.constant 0 : index
    %17 = vector.load %arg4[%c0_9, %c0_10] : memref<32x32xbf16, #tpu.memory_space<vmem>>, vector<32x32xbf16>
    %c0_11 = arith.constant 0 : index
    %c0_12 = arith.constant 0 : index
    %18 = vector.load %arg5[%c0_11, %c0_12] : memref<32x16xf32, #tpu.memory_space<vmem>>, vector<32x16xf32>
    %cst_13 = arith.constant 0.000000e+00 : f32
    %19 = vector.broadcast %cst_13 : f32 to vector<1x16xf32>
    %20 = tpu.concatenate %15, %16 in 0 : vector<16x16xbf16>, vector<16x16xbf16> -> vector<32x16xbf16>
    %cst_14 = arith.constant dense<0.000000e+00> : vector<32x16xf32>
    %21 = tpu.matmul %17, %20, %cst_14 {dimension_numbers = #tpu.dot_dimension_numbers<[1], [0], [0], [1], [0, 0, 1, 1], [], []>} : vector<32x32xbf16>, vector<32x16xbf16>, vector<32x16xf32> -> vector<32x16xf32>
    %22 = arith.mulf %21, %21 : vector<32x16xf32>
    %23 = arith.mulf %18, %22 : vector<32x16xf32>
    %cst_15 = arith.constant dense<0.000000e+00> : vector<16xf32>
    %24 = vector.multi_reduction <add>, %23, %cst_15 [0] : vector<32x16xf32> to vector<16xf32>
    %25 = vector.shape_cast %24 : vector<16xf32> to vector<1x16xf32>
    %26 = arith.addf %19, %25 : vector<1x16xf32>
    %c0_16 = arith.constant 0 : index
    %c0_17 = arith.constant 0 : index
    %c0_18 = arith.constant 0 : index
    %27 = vector.load %arg6[%c0_16, %c0_17, %c0_18] : memref<1x1x16xf32, #tpu.memory_space<vmem>>, vector<1x1x16xf32>
    %28 = vector.shape_cast %27 : vector<1x1x16xf32> to vector<1x16xf32>
    %29 = vector.shape_cast %26 : vector<1x16xf32> to vector<1x1x16xf32>
    tpu.vector_store %arg6[%c0_16, %c0_17, %c0_18], %29 {strides = array<i32>} : memref<1x1x16xf32, #tpu.memory_space<vmem>>, vector<1x1x16xf32>,
    return
  }
  func.func @transform_0(%arg0: i32) -> (i32, i32) {
    %c0_i32 = arith.constant 0 : i32
    %c0_i32_0 = arith.constant 0 : i32
    return %arg0, %c0_i32 : i32, i32
  }
  func.func @transform_1(%arg0: i32) -> (i32, i32) {
    %c0_i32 = arith.constant 0 : i32
    %c0_i32_0 = arith.constant 0 : i32
    return %arg0, %c0_i32 : i32, i32
  }
  func.func @transform_2(%arg0: i32) -> (i32, i32) {
    %c0_i32 = arith.constant 0 : i32
    %c0_i32_0 = arith.constant 0 : i32
    %c0_i32_1 = arith.constant 0 : i32
    return %c0_i32, %c0_i32_0 : i32, i32
  }
  func.func @transform_3(%arg0: i32) -> (i32, i32) {
    %c0_i32 = arith.constant 0 : i32
    %c0_i32_0 = arith.constant 0 : i32
    %c0_i32_1 = arith.constant 0 : i32
    return %c0_i32, %c0_i32_0 : i32, i32
  }
  func.func @transform_4(%arg0: i32) -> (i32, i32) {
    %c0_i32 = arith.constant 0 : i32
    %c0_i32_0 = arith.constant 0 : i32
    %c0_i32_1 = arith.constant 0 : i32
    return %c0_i32, %c0_i32_0 : i32, i32
  }
  func.func @transform_5(%arg0: i32) -> (i32, i32, i32) {
    %c0_i32 = arith.constant 0 : i32
    %c0_i32_0 = arith.constant 0 : i32
    %c0_i32_1 = arith.constant 0 : i32
    return %arg0, %c0_i32, %c0_i32_0 : i32, i32, i32
  }
}

</mosaic_0001>

<bundles_post_ra>
// kernel: tpu_custom_call.1
= control target key start
LH: loop header
LB: loop body
LE: loop exit
PB: predicated region body
PF: predicated region fallthrough
CT: control target
= control target key end

     0   :  { %10 = vsyncpa [#allocation3], 0  ;;  %s806_s0 = inlined_call_operand.vmem [shape: f32[32,16], index: 0, kind: input, shape index: {}]   ;;  %s807_s1 = inlined_call_operand.vmem [shape: f32[32,16], index: 1, kind: input, shape index: {}]   ;;  %s808_s2 = inlined_call_operand.vmem [shape: bf16[16,32], index: 2, kind: input, shape index: {}]   ;;  %s809_s3 = inlined_call_operand.vmem [shape: bf16[32,32], index: 3, kind: input, shape index: {}]   ;;  %s810_s4 = inlined_call_operand.vmem [shape: f32[32,16], index: 4, kind: input, shape index: {}]   ;;  %s811_s5 = inlined_call_operand.hbm [shape: f32[2,1,16], index: 5, kind: output, shape index: {}]  }
   0x1   :  { %12 = vsyncpa [#allocation3 + $0x1], 0  ;;  %s678_s18 = smov 0   ;;  %s680_s19 = smov 0  }
   0x2   :  { %s682_s20 = smov 0   ;;  %s684_s21 = smov 0  }
   0x3 LB: > { %s699_s22 = sadd.s32 4294967295, %s642_s21   ;;  %s498_s23 = sadd.s32 4294967294, %s642_s21   ;;  %s642_s21 = sphi %s684_s21, %s817_s21   ;;  %s638_s20 = sphi %s682_s20, %s816_s20   ;;  %s634_s19 = sphi %s680_s19, %s815_s19   ;;  %s630_s18 = sphi %s678_s18, %s814_s18  }
   0x4   : > { %s703_s24 = sadd.s32 1, %s642_s21   ;;  %s140_s25 = sadd.s32 1, %s638_s20 }
   0x5   : > { %s137_s26 = ssub.s32 %s642_s21, %s703_s24  ;;  %p150_p0 = scmp.ne.s32.totalorder %s638_s20, %s634_s19 }
   0x6   : > { %p138_p1 = scmp.eq.s32.totalorder %s137_s26, 0  ;;  %p151_p2 = scmp.eq.s32.totalorder %s699_s22, 1 }
   0x7   : > { %p156_p3 = scmp.ne.s32.totalorder %s634_s19, %s630_s18  ;;  %p157_p4 = scmp.eq.s32.totalorder %s498_s23, 1 }
   0x8   : > { %s714_s27 = scalar_select %p138_p1, %s638_s20, %s140_s25  }
   0x9   : > { %p716_p5 = por %p151_p2, %p150_p0  ;;  %p720_p6 = por %p157_p4, %p156_p3 }
   0xa   : > { %p501_p7 = scmp.ge.s32.totalorder %s642_s21, 1  ;;  %p202_p8 = scmp.lt.s32.totalorder %s642_s21, 3 }
   0xc   : > { %p203_p9 = pnand %p501_p7, %p202_p8 }
   0xd   : > { %v577_v0 = vld [vmem:[%s808_s2] sm:$0xff] (!%p203_p9)   ;;  %v644_v1 = vmov (!%p203_p9), 0.0   ;;  %s502_s7 = sshll.u32 (!%p203_p9), %s699_s22, 1  ;;  %vm645_vm0 = vmmov (!%p203_p9), 0   ;;  %vm270_vm1 = vcmask (!%p203_p9), 130048   ;;  %vm338_vm2 = vcmask (!%p203_p9), 261120  }
   0xe   : > { %206 = sbr.rel (%p203_p9) target bundleno = 624 (0x270), region = 40  ;;  %521 = vmatprep.subr.bf16.mxu0 (!%p203_p9), %v644_v1  ;;  %523 = vmatprep.mubr.msk.bf16.mxu0 (!%p203_p9), %vm645_vm0, %v644_v1  ;;  %p235_p10 = scmp.lt.s32.totalorder (!%p203_p9), %s502_s7, 3  ;;  %v578_v17 = vld [vmem:[%s809_s3] sm:$0xff] (!%p203_p9)   ;;  %v579_v24 = vld [vmem:[%s809_s3 + $0x8] sm:$0xff] (!%p203_p9)   ;;  %v322_v31 = vld [vmem:[%s810_s4 + $0x10] sm:$0xff] (!%p203_p9)  ;;  %vm416_vm3 = vcmask (!%p203_p9), 122880  }
   0xf   : > { %522 = vmatpush3.bf16.msra.mxu0 (!%p203_p9), %v577_v0  ;;  %531 = vmatprep.mubr.msk.bf16.mxu1 (!%p203_p9), %vm338_vm2, %v578_v17  ;;  %s646_s17 = smov (!%p203_p9), 112   ;;  %v320_v26 = vld [vmem:[%s810_s4] sm:$0xff] (!%p203_p9)  ;;  %v321_v32 = vld [vmem:[%s810_s4 + $0x8] sm:$0xff] (!%p203_p9)  ;;  %v323_v37 = vld [vmem:[%s810_s4 + $0x18] sm:$0xff] (!%p203_p9)  ;;  %s232_s12 = sand.u32 (!%p203_p9), 1, %s634_s19  }
  0x10   : > { %s512_s13 = sshll.u32 (!%p203_p9), %s699_s22, 4  ;;  %s419_s25 = scalar_lea.sflag (!%p203_p9), [#allocation3], %s232_s12 }
  0x11   : > { %s764_s23 = scalar_lea.hbm (!%p203_p9), %s811_s5, %s512_s13  ;;  %s647_s22 = smov (!%p203_p9), [#allocation2]  }
  0x12   : > { %s584_s30 = sshll.u32 (!%p203_p9), %s647_s22, 4  ;;  %s585_s30 = int_to_ptr.vmem [resolvable:$false] %s584_s30 }
  0x13   : > { %s586_s6 = scalar_lea.vmem (!%p203_p9), %s585_s30, 32 }
  0x15   : > { %s819_s7 = smov (!%p235_p10, %s502_s7), 3 }
  0x16   : > { %s503_s8 = sshll.u32 %s819_s7, 3 }
  0x17   : > { %s238_s11 = scalar_lea.vmem %s806_s0, %s503_s8  ;;  %s244_s14 = scalar_lea.vmem %s807_s1, %s503_s8 }
  0x18   : > { %v247_v2 = vld [vmem:[%s238_s11] sm:$0xff]  ;;  %v248_v3 = vld [vmem:[%s238_s11 + $0x8] sm:$0xff] }
  0x19   : > { %v251_v4 = vmul.f32 4.0, %v247_v2  ;;  %v252_v5 = vmul.f32 4.0, %v248_v3  ;;  %v249_v10 = vld [vmem:[%s244_s14] sm:$0xff]  ;;  %v250_v11 = vld [vmem:[%s244_s14 + $0x8] sm:$0xff]  ;;  %s233_s14 = scalar_lea.vmem [#allocation2], %s232_s12 }
  0x1a   : > { %s431_s15 = sshll.u32 %s233_s14, 4  ;;  %s766_s15 = int_to_ptr.vmem [resolvable:$true] %s431_s15 }
  0x1b   : > { %v253_v6 = vmax.f32 %v251_v4, 0.0  ;;  %v254_v7 = vmax.f32 %v252_v5, 0.0  ;;  %s580_s26 = scalar_lea.vmem %s766_s15, 16  ;;  %p587_p0 = scmp.lt.s32.totalorder %s766_s15, %s585_s30 }
  0x1c   : > { %p581_p11 = scmp.ne.s32.totalorder %s766_s15, %s580_s26  ;;  %p588_p1 = scmp.lt.s32.totalorder %s586_s6, %s580_s26 }
  0x1d   : > { %v255_v8 = vmin.f32 %v253_v6, 1.0  ;;  %v256_v9 = vmin.f32 %v254_v7, 1.0 }
  0x1e   : > { %p582_p12 = pnand %p581_p11, %p716_p5  ;;  %p589_p2 = por %p588_p1, %p587_p0 }
  0x1f   : > { %v257_v12 = vmul.f32 0.35, %v255_v8  ;;  %v258_v13 = vmul.f32 0.35, %v256_v9 }
  0x20   : > { %p583_p13 = pneg %p582_p12 }
  0x21   : > { %v259_v14 = vadd.f32 %v257_v12, %v249_v10  ;;  %v260_v15 = vadd.f32 %v258_v13, %v250_v11 }
  0x22   : > { %p590_p3 = pnand %p589_p2, %p583_p13 }
  0x23   : > { %v261_v16 = vpack.c.bf16 %v260_v15, %v259_v14 }
  0x25   : > { %524 = vmatmul.mubr.msk.bf16.vlgmr.msra.gmra.mrb[0].mxu0 %vm270_vm1, %v261_v16 }
  0xf8   : > { %v308_v18 = vpop.f32.mrb[0].mxu0 }
  0xf9   : > { %v525_v19 = vpop.f32.mrb[1].mxu0 }
  0xfa   : > { %v311_v20 = vpop.f32.mrb[2].mxu0 }
  0xfb   : > { %v315_v21 = vpack.c.bf16 %v311_v20, %v308_v18  ;;  %v526_v22 = vpop.f32.mrb[3].mxu0 }
  0xfd   : > { %325 = vrot.lane.b32.xlu0 %v315_v21, %s646_s17  ;;  %527 = vmatprep.subr.bf16.mxu1 %v315_v21 }
  0xfe   : > { %528 = vmatpush3.bf16.msra.mxu1 %v315_v21 }
 0x16f   : > { %v326_v23 = vpop.permute.xlu0 %325 }
 0x170   : > { %529 = vmatprep.subr.bf16.mxu1 %v326_v23 }
 0x171   : > { %530 = vmatpush3.bf16.msra.mxu1 %v326_v23 }
 0x174   : > { %532 = vmatmul.mubr.msk.bf16.vlgmr.msra.gmra.mrb[0].mxu1 %vm338_vm2, %v579_v24 }
 0x247   : > { %v533_v25 = vpop.f32.mrb[0].mxu1 }
 0x248   : > { %v379_v27 = vpop.f32.mrb[1].mxu1  ;;  %v396_v28 = vmul.f32 %v533_v25, %v533_v25 }
 0x249   : > { %v394_v29 = vmul.f32 %v379_v27, %v379_v27  ;;  %v534_v30 = vpop.f32.mrb[2].mxu1 }
 0x24a   : > { %v382_v33 = vpop.f32.mrb[3].mxu1  ;;  %v397_v35 = vmul.f32 %v534_v30, %v534_v30  ;;  %v400_v38 = vmul.f32 %v396_v28, %v322_v31 }
 0x24b   : > { %v398_v34 = vmul.f32 %v394_v29, %v320_v26  ;;  %v395_v36 = vmul.f32 %v382_v33, %v382_v33 }
 0x24c   : > { %v401_v41 = vmul.f32 %v397_v35, %v323_v37  ;;  %v405_v44 = vsel %vm270_vm1, %v400_v38, 0.0 }
 0x24d   : > { %v399_v39 = vmul.f32 %v395_v36, %v321_v32  ;;  %v402_v40 = vsel %vm270_vm1, %v398_v34, 0.0 }
 0x24e   : > { %v407_v46 = vsel %vm270_vm1, %v401_v41, 0.0 }
 0x24f   : > { %v403_v42 = vsel %vm270_vm1, %v399_v39, 0.0 }
 0x250   : > { %v404_v43 = vadd.f32 %v403_v42, %v402_v40 }
 0x252   : > { %v406_v45 = vadd.f32 %v405_v44, %v404_v43 }
 0x254   : > { %v408_v47 = vadd.f32 %v407_v46, %v406_v45 }
 0x256   : > { %v409_v48 = vrot.slane %v408_v47, 4 }
 0x258   : > { %v410_v49 = vadd.f32 %v409_v48, %v408_v47 }
 0x25a   : > { %v411_v50 = vrot.slane %v410_v49, 2 }
 0x25c   : > { %v412_v51 = vadd.f32 %v411_v50, %v410_v49 }
 0x25e   : > { %v413_v52 = vrot.slane %v412_v51, 1 }
 0x260   : > { %v414_v53 = vadd.f32 %v413_v52, %v412_v51 }
 0x262   : > { %417 = vst.msk [vmem:[%s233_s14] sm:$0x1] %vm416_vm3, %v414_v53 }
 0x263   : > { %593 = shalt.err (!%p590_p3)
}
 0x264   : > { %s594_s7 = scalar_lea.hbm %s764_s23, 16  ;;  %s598_s10 = scalar_lea.hbm %s811_s5, 32 }
 0x265   : > { %p595_p4 = scmp.ne.s32.totalorder %s764_s23, %s594_s7  ;;  %p599_p9 = scmp.lt.u32.totalorder %s764_s23, %s811_s5 }
 0x266   : > { %p600_p10 = scmp.lt.u32.totalorder %s598_s10, %s594_s7  ;;  %p602_p12 = scmp.lt.u32.totalorder %s594_s7, %s764_s23 }
 0x267   : > { %p596_p7 = pnand %p595_p4, %p716_p5 }
 0x268   : > { %p601_p11 = por %p600_p10, %p599_p9 }
 0x269   : > { %p597_p8 = pneg %p596_p7 }
 0x26a   : > { %p603_p13 = por %p602_p12, %p601_p11 }
 0x26c   : > { %p604_p0 = pnand %p603_p13, %p597_p8 }
 0x26e   : > { %607 = shalt.err (!%p604_p0)
}
 0x26f   : > { %535 = dma.vmem_to_hbm [thread:$0]  (%p716_p5), %s766_s15, 16, %s764_s23, %s419_s25  }
 0x270 PF: > { %p541_p1 = scmp.ge.s32.totalorder %s642_s21, 2  ;;  %s443_s13 = sand.u32 1, %s630_s18  }
 0x271   : > { %s444_s14 = scalar_lea.sflag [#allocation3], %s443_s13 }
 0x272   : > { %p538_p2 = pnand %p541_p1, %p720_p6 }
 0x274   : > { %625 = dma.done.wait (!%p538_p2), %s444_s14, 16  }
 0x275   : > { %627 = vsyncadd (!%p538_p2), %s444_s14, 4294967280  ;;  %p15_p3 = scmp.ge.s32.totalorder %s703_s24, 4   ;;  %s814_s18 = smov %s634_s19 }
 0x276   : > { %s815_s19 = smov %s638_s20  ;;  %s816_s20 = smov %s714_s27 }
 0x277   : > { %s817_s21 = smov %s703_s24  ;;  %17 = sbr.rel (!%p15_p3) target bundleno = 3 (0x3), region = 78 }
 0x27e   :  { %448 = vsyncpa [#allocation3], 1 }
 0x27f   :  { %450 = vsyncpa [#allocation3 + $0x1], 1 }

</bundles_post_ra>
